<compile_context>
chip_gen: v5e
topology: v5e:2x2
jax: 0.10.0
libtpu: 0.0.40
codegen_flags: <defaults>
</compile_context>

<pallas_src>
import jax
import jax.numpy as jnp
from jax import lax
from jax.experimental import pallas as pl
from jax.experimental.pallas import tpu as pltpu

DROP_P = 0.4
# P(keep) = (2^32 - threshold) / 2^32 = 1 - p (exact to <1 ulp of 2^-32)
DROP_THRESHOLD = int(round(DROP_P * (1 << 32)))  # 1717986918


def _hash_u32(x):
    """lowbias32-style integer mixer (all uint32, wraps mod 2^32)."""
    x = jnp.asarray(x, jnp.uint32)
    x = (x ^ (x >> 16)) * jnp.uint32(0x7FEB352D)
    x = (x ^ (x >> 15)) * jnp.uint32(0x846CA68B)
    x = x ^ (x >> 16)
    return x


def critic_kernel(seed_ref,                       # scalar-prefetch (SMEM)
                  x_ref, w1_ref, b1_ref, w2_ref, b2_ref, w3_ref, b3_ref,
                  o_ref):
    x = x_ref[...]

    # fc1 + ReLU
    h1 = jnp.dot(x, w1_ref[...], preferred_element_type=jnp.float32) + b1_ref[...]
    h1 = jnp.maximum(h1, 0.0)

    # fc2 + sigmoid (exp goes to EUP)
    z2 = jnp.dot(h1, w2_ref[...], preferred_element_type=jnp.float32) + b2_ref[...]
    h2 = jax.nn.sigmoid(z2)

    # dropout(p=0.4), training mode.  Counter-based hash -> uint32 bits,
    # integer-threshold compare.  Counter is unique per (tile, row, col) and
    # mixed with the caller-supplied seed so every tile / core / step differs.
    tb, hdim = h2.shape
    tile = pl.program_id(0).astype(jnp.uint32)
    rows = lax.broadcasted_iota(jnp.uint32, (tb, hdim), 0)
    cols = lax.broadcasted_iota(jnp.uint32, (tb, hdim), 1)
    seed = seed_ref[0].astype(jnp.uint32)
    ctr = seed + (tile * jnp.uint32(tb) + rows) * jnp.uint32(hdim) + cols
    bits = _hash_u32(ctr)
    keep = bits >= jnp.uint32(DROP_THRESHOLD)     # P(keep) = 1 - p
    # 1/(1-p) scale is folded into w3 by the wrapper (exact).
    h2d = jnp.where(keep, h2, 0.0)

    # fc3
    o_ref[...] = jnp.dot(h2d, w3_ref[...], preferred_element_type=jnp.float32) + b3_ref[...]


def critic_forward(x, params, seed, *, block_b=512):
    """Fused Critic forward.  x: [B, F] float32.  seed: python int / int32."""
    w1, b1, w2, b2, w3, b3 = params
    B, F = x.shape
    O = w3.shape[1]

    # Fold the inverted-dropout scale into fc3 weights (exact:
    # (h*keep*s) @ W3 == (h*keep) @ (s*W3)); bias is unaffected.
    w3s = w3 * jnp.float32(1.0 / (1.0 - DROP_P))

    # Batch tile: as large as allowed (VMEM is never the binder at these
    # widths), multiple of 8 sublanes for f32.
    TB = max(8, (min(block_b, B) // 8) * 8)
    Bp = ((B + TB - 1) // TB) * TB
    if Bp != B:
        x = jnp.pad(x, ((0, Bp - B), (0, 0)))
    grid = (Bp // TB,)

    seed_arr = jnp.asarray(seed, dtype=jnp.int32).reshape((1,))

    def resident(shape):
        # weights/biases: same (whole-array) block at every grid step ->
        # stay VMEM-resident across the batch loop.
        return pl.BlockSpec(shape, lambda i, s, _shape=shape: tuple(0 for _ in _shape))

    grid_spec = pltpu.PrefetchScalarGridSpec(
        num_scalar_prefetch=1,
        grid=grid,
        in_specs=[
            pl.BlockSpec((TB, F), lambda i, s: (i, 0)),
            resident(w1.shape), resident(b1.shape),
            resident(w2.shape), resident(b2.shape),
            resident(w3.shape), resident(b3.shape),
        ],
        out_specs=pl.BlockSpec((TB, O), lambda i, s: (i, 0)),
    )

    out = pl.pallas_call(
        critic_kernel,
        out_shape=jax.ShapeDtypeStruct((Bp, O), jnp.float32),
        grid_spec=grid_spec,
        compiler_params=pltpu.CompilerParams(
            dimension_semantics=("parallel",)),   # megacore-shardable on v7x
    )(seed_arr, x, w1, b1, w2, b2, w3s, b3)

    return out[:B]


def init_params(key, input_size, hidden_size, output_size):
    """Deterministic init mimicking nn.Linear's U(-1/sqrt(fan_in), 1/sqrt(fan_in))."""
    ks = jax.random.split(key, 6)

    def lin(kw, kb, fan_in, fan_out):
        bound = 1.0 / jnp.sqrt(jnp.float32(fan_in))
        w = jax.random.uniform(kw, (fan_in, fan_out), jnp.float32, -bound, bound)
        b = jax.random.uniform(kb, (1, fan_out), jnp.float32, -bound, bound)
        return w, b

    w1, b1 = lin(ks[0], ks[1], input_size, hidden_size)
    w2, b2 = lin(ks[2], ks[3], hidden_size, hidden_size)
    w3, b3 = lin(ks[4], ks[5], hidden_size, output_size)
    return (w1, b1, w2, b2, w3, b3)


if __name__ == "__main__":
    # CartPole-v1: observation dim = 4, action dim = 2
    input_size, hidden_size, output_size = 4, 32, 2
    batch = 64

    key = jax.random.PRNGKey(0)
    k_x, k_p = jax.random.split(key)
    x = jax.random.normal(k_x, (batch, input_size), dtype=jnp.float32)
    params = init_params(k_p, input_size, hidden_size, output_size)

    # block_b=32 -> grid=(2,) so batch tiling / pipelining is exercised even
    # at this small demo size.
    out = critic_forward(x, params, seed=0, block_b=32)
    out = jax.block_until_ready(out)
    assert out.shape == (batch, output_size)
    assert jnp.all(jnp.isfinite(out))
    print("KERNEL_OK")
</pallas_src>

<mosaic_0001>
module attributes {stable_mosaic.version = 11 : i64} {
  func.func @critic_kernel(%arg0: i32, %arg1: memref<1xi32, #tpu.memory_space<smem>>, %arg2: memref<32x4xf32, #tpu.memory_space<vmem>>, %arg3: memref<4x32xf32, #tpu.memory_space<vmem>>, %arg4: memref<1x32xf32, #tpu.memory_space<vmem>>, %arg5: memref<32x32xf32, #tpu.memory_space<vmem>>, %arg6: memref<1x32xf32, #tpu.memory_space<vmem>>, %arg7: memref<32x2xf32, #tpu.memory_space<vmem>>, %arg8: memref<1x2xf32, #tpu.memory_space<vmem>>, %arg9: memref<32x2xf32, #tpu.memory_space<vmem>>) attributes {dimension_semantics = [#tpu.dimension_semantics<parallel>], iteration_bounds = array<i64: 2>, scalar_prefetch = 1 : i64, scratch_operands = 0 : i64, tpu.core_type = #tpu.core_type<tc>, window_params = [{transform_indices = @transform_0, window_bounds = array<i64: 32, 4>}, {pipeline_mode = #tpu.pipeline_mode<synchronous>, transform_indices = @transform_1, window_bounds = array<i64: 4, 32>}, {pipeline_mode = #tpu.pipeline_mode<synchronous>, transform_indices = @transform_2, window_bounds = array<i64: 1, 32>}, {pipeline_mode = #tpu.pipeline_mode<synchronous>, transform_indices = @transform_3, window_bounds = array<i64: 32, 32>}, {pipeline_mode = #tpu.pipeline_mode<synchronous>, transform_indices = @transform_4, window_bounds = array<i64: 1, 32>}, {pipeline_mode = #tpu.pipeline_mode<synchronous>, transform_indices = @transform_5, window_bounds = array<i64: 32, 2>}, {pipeline_mode = #tpu.pipeline_mode<synchronous>, transform_indices = @transform_6, window_bounds = array<i64: 1, 2>}, {transform_indices = @transform_7, window_bounds = array<i64: 32, 2>}]} {
    %c0 = arith.constant 0 : index
    %c0_0 = arith.constant 0 : index
    %0 = vector.load %arg2[%c0, %c0_0] : memref<32x4xf32, #tpu.memory_space<vmem>>, vector<32x4xf32>
    %c0_1 = arith.constant 0 : index
    %c0_2 = arith.constant 0 : index
    %1 = vector.load %arg3[%c0_1, %c0_2] : memref<4x32xf32, #tpu.memory_space<vmem>>, vector<4x32xf32>
    %cst = arith.constant dense<0.000000e+00> : vector<32x32xf32>
    %2 = tpu.matmul %0, %1, %cst {dimension_numbers = #tpu.dot_dimension_numbers<[1], [0], [0], [1], [0, 0, 1, 1], [], []>} : vector<32x4xf32>, vector<4x32xf32>, vector<32x32xf32> -> vector<32x32xf32>
    %c0_3 = arith.constant 0 : index
    %c0_4 = arith.constant 0 : index
    %3 = vector.load %arg4[%c0_3, %c0_4] : memref<1x32xf32, #tpu.memory_space<vmem>>, vector<1x32xf32>
    %4 = vector.broadcast %3 : vector<1x32xf32> to vector<32x32xf32>
    %5 = arith.addf %2, %4 : vector<32x32xf32>
    %cst_5 = arith.constant 0.000000e+00 : f32
    %6 = vector.broadcast %cst_5 : f32 to vector<32x32xf32>
    %7 = arith.maximumf %5, %6 : vector<32x32xf32>
    %c0_6 = arith.constant 0 : index
    %c0_7 = arith.constant 0 : index
    %8 = vector.load %arg5[%c0_6, %c0_7] : memref<32x32xf32, #tpu.memory_space<vmem>>, vector<32x32xf32>
    %cst_8 = arith.constant dense<0.000000e+00> : vector<32x32xf32>
    %9 = tpu.matmul %7, %8, %cst_8 {dimension_numbers = #tpu.dot_dimension_numbers<[1], [0], [0], [1], [0, 0, 1, 1], [], []>} : vector<32x32xf32>, vector<32x32xf32>, vector<32x32xf32> -> vector<32x32xf32>
    %c0_9 = arith.constant 0 : index
    %c0_10 = arith.constant 0 : index
    %10 = vector.load %arg6[%c0_9, %c0_10] : memref<1x32xf32, #tpu.memory_space<vmem>>, vector<1x32xf32>
    %11 = vector.broadcast %10 : vector<1x32xf32> to vector<32x32xf32>
    %12 = arith.addf %9, %11 : vector<32x32xf32>
    %13 = arith.negf %12 : vector<32x32xf32>
    %14 = math.exp %13 : vector<32x32xf32>
    %cst_11 = arith.constant 1.000000e+00 : f32
    %15 = vector.broadcast %cst_11 : f32 to vector<32x32xf32>
    %16 = arith.addf %15, %14 : vector<32x32xf32>
    %17 = arith.divf %15, %16 : vector<32x32xf32>
    %18 = tpu.iota {dimensions = array<i32: 0>} : vector<32x32xi32>
    %19 = tpu.iota {dimensions = array<i32: 1>} : vector<32x32xi32>
    %c0_12 = arith.constant 0 : index
    %20 = memref.load %arg1[%c0_12] : memref<1xi32, #tpu.memory_space<smem>>
    %c32_i32 = arith.constant 32 : i32
    %21 = arith.muli %arg0, %c32_i32 : i32
    %22 = vector.broadcast %21 : i32 to vector<32x32xi32>
    %23 = arith.addi %22, %18 : vector<32x32xi32>
    %c32_i32_13 = arith.constant 32 : i32
    %24 = vector.broadcast %c32_i32_13 : i32 to vector<32x32xi32>
    %25 = arith.muli %23, %24 : vector<32x32xi32>
    %26 = vector.broadcast %20 : i32 to vector<32x32xi32>
    %27 = arith.addi %26, %25 : vector<32x32xi32>
    %28 = arith.addi %27, %19 : vector<32x32xi32>
    %c16_i32 = arith.constant 16 : i32
    %29 = vector.broadcast %c16_i32 : i32 to vector<32x32xi32>
    %30 = arith.shrui %28, %29 : vector<32x32xi32>
    %31 = arith.xori %28, %30 : vector<32x32xi32>
    %c2146121005_i32 = arith.constant 2146121005 : i32
    %32 = vector.broadcast %c2146121005_i32 : i32 to vector<32x32xi32>
    %33 = arith.muli %31, %32 : vector<32x32xi32>
    %c15_i32 = arith.constant 15 : i32
    %34 = vector.broadcast %c15_i32 : i32 to vector<32x32xi32>
    %35 = arith.shrui %33, %34 : vector<32x32xi32>
    %36 = arith.xori %33, %35 : vector<32x32xi32>
    %c-2073254261_i32 = arith.constant -2073254261 : i32
    %37 = vector.broadcast %c-2073254261_i32 : i32 to vector<32x32xi32>
    %38 = arith.muli %36, %37 : vector<32x32xi32>
    %c16_i32_14 = arith.constant 16 : i32
    %39 = vector.broadcast %c16_i32_14 : i32 to vector<32x32xi32>
    %40 = arith.shrui %38, %39 : vector<32x32xi32>
    %41 = arith.xori %38, %40 : vector<32x32xi32>
    %c1717986918_i32 = arith.constant 1717986918 : i32
    %42 = vector.broadcast %c1717986918_i32 : i32 to vector<32x32xi32>
    %43 = arith.cmpi uge, %41, %42 : vector<32x32xi32>
    %cst_15 = arith.constant 0.000000e+00 : f32
    %44 = vector.broadcast %cst_15 : f32 to vector<32x32xf32>
    %45 = arith.select %43, %17, %44 : vector<32x32xi1>, vector<32x32xf32>
    %c0_16 = arith.constant 0 : index
    %c0_17 = arith.constant 0 : index
    %46 = vector.load %arg7[%c0_16, %c0_17] : memref<32x2xf32, #tpu.memory_space<vmem>>, vector<32x2xf32>
    %cst_18 = arith.constant dense<0.000000e+00> : vector<32x2xf32>
    %47 = tpu.matmul %45, %46, %cst_18 {dimension_numbers = #tpu.dot_dimension_numbers<[1], [0], [0], [1], [0, 0, 1, 1], [], []>} : vector<32x32xf32>, vector<32x2xf32>, vector<32x2xf32> -> vector<32x2xf32>
    %c0_19 = arith.constant 0 : index
    %c0_20 = arith.constant 0 : index
    %48 = vector.load %arg8[%c0_19, %c0_20] : memref<1x2xf32, #tpu.memory_space<vmem>>, vector<1x2xf32>
    %49 = vector.broadcast %48 : vector<1x2xf32> to vector<32x2xf32>
    %50 = arith.addf %47, %49 : vector<32x2xf32>
    %c0_21 = arith.constant 0 : index
    %c0_22 = arith.constant 0 : index
    %51 = vector.load %arg9[%c0_21, %c0_22] : memref<32x2xf32, #tpu.memory_space<vmem>>, vector<32x2xf32>
    tpu.vector_store %arg9[%c0_21, %c0_22], %50 {strides = array<i32>} : memref<32x2xf32, #tpu.memory_space<vmem>>, vector<32x2xf32>,
    return
  }
  func.func @transform_0(%arg0: i32, %arg1: memref<1xi32, #tpu.memory_space<smem>>) -> (i32, i32) {
    %c0_i32 = arith.constant 0 : i32
    %c0_i32_0 = arith.constant 0 : i32
    return %arg0, %c0_i32 : i32, i32
  }
  func.func @transform_1(%arg0: i32, %arg1: memref<1xi32, #tpu.memory_space<smem>>) -> (i32, i32) {
    %c0_i32 = arith.constant 0 : i32
    %c0_i32_0 = arith.constant 0 : i32
    %c0_i32_1 = arith.constant 0 : i32
    return %c0_i32, %c0_i32_0 : i32, i32
  }
  func.func @transform_2(%arg0: i32, %arg1: memref<1xi32, #tpu.memory_space<smem>>) -> (i32, i32) {
    %c0_i32 = arith.constant 0 : i32
    %c0_i32_0 = arith.constant 0 : i32
    %c0_i32_1 = arith.constant 0 : i32
    return %c0_i32, %c0_i32_0 : i32, i32
  }
  func.func @transform_3(%arg0: i32, %arg1: memref<1xi32, #tpu.memory_space<smem>>) -> (i32, i32) {
    %c0_i32 = arith.constant 0 : i32
    %c0_i32_0 = arith.constant 0 : i32
    %c0_i32_1 = arith.constant 0 : i32
    return %c0_i32, %c0_i32_0 : i32, i32
  }
  func.func @transform_4(%arg0: i32, %arg1: memref<1xi32, #tpu.memory_space<smem>>) -> (i32, i32) {
    %c0_i32 = arith.constant 0 : i32
    %c0_i32_0 = arith.constant 0 : i32
    %c0_i32_1 = arith.constant 0 : i32
    return %c0_i32, %c0_i32_0 : i32, i32
  }
  func.func @transform_5(%arg0: i32, %arg1: memref<1xi32, #tpu.memory_space<smem>>) -> (i32, i32) {
    %c0_i32 = arith.constant 0 : i32
    %c0_i32_0 = arith.constant 0 : i32
    %c0_i32_1 = arith.constant 0 : i32
    return %c0_i32, %c0_i32_0 : i32, i32
  }
  func.func @transform_6(%arg0: i32, %arg1: memref<1xi32, #tpu.memory_space<smem>>) -> (i32, i32) {
    %c0_i32 = arith.constant 0 : i32
    %c0_i32_0 = arith.constant 0 : i32
    %c0_i32_1 = arith.constant 0 : i32
    return %c0_i32, %c0_i32_0 : i32, i32
  }
  func.func @transform_7(%arg0: i32, %arg1: memref<1xi32, #tpu.memory_space<smem>>) -> (i32, i32) {
    %c0_i32 = arith.constant 0 : i32
    %c0_i32_0 = arith.constant 0 : i32
    return %arg0, %c0_i32 : i32, i32
  }
}

</mosaic_0001>

<bundles_post_ra>
// kernel: tpu_custom_call.1
= control target key start
LH: loop header
LB: loop body
LE: loop exit
PB: predicated region body
PF: predicated region fallthrough
CT: control target
= control target key end

     0   :  { %s778_s29 = smov 0   ;;  %s856_s0 = inlined_call_operand.<no memory space> [shape: s32[1], index: 0, kind: input, shape index: {}]   ;;  %s857_s1 = inlined_call_operand.vmem [shape: f32[64,4], index: 1, kind: input, shape index: {}]   ;;  %s858_s2 = inlined_call_operand.vmem [shape: f32[4,32], index: 2, kind: input, shape index: {}]   ;;  %s859_s3 = inlined_call_operand.vmem [shape: f32[1,32], index: 3, kind: input, shape index: {}]   ;;  %s860_s4 = inlined_call_operand.vmem [shape: f32[32,32], index: 4, kind: input, shape index: {}]   ;;  %s861_s5 = inlined_call_operand.vmem [shape: f32[1,32], index: 5, kind: input, shape index: {}]   ;;  %s862_s6 = inlined_call_operand.vmem [shape: f32[32,2], index: 6, kind: input, shape index: {}]   ;;  %s863_s7 = inlined_call_operand.vmem [shape: f32[1,2], index: 7, kind: input, shape index: {}]   ;;  %s864_s8 = inlined_call_operand.vmem [shape: f32[64,2], index: 8, kind: output, shape index: {}]  }
   0x1   :  { %13 = sst [smem:[#allocation3]] %s856_s0 }
   0x2 LB: > { %s654_s30 = sadd.s32 4294967295, %s728_s29   ;;  %p658_p0 = scmp.ge.s32.totalorder %s728_s29, 1  ;;  %s728_s29 = sphi %s778_s29, %s19_s29  }
   0x3   : > { %p240_p1 = scmp.lt.s32.totalorder %s728_s29, 3 }
   0x5   : > { %p241_p2 = pnand %p658_p0, %p240_p1 }
   0x6   : > { %s659_s0 = sshll.u32 (!%p241_p2), %s654_s30, 2  ;;  %s676_s25 = sshll.u32 (!%p241_p2), %s654_s30, 5 }
   0x7   : > { %244 = sbr.rel (%p241_p2) target bundleno = 468 (0x1d4), region = 48  ;;  %p273_p3 = scmp.lt.s32.totalorder (!%p241_p2), %s659_s0, 7 }
   0x8   : > { %s476_s26 = sld [smem:[#allocation3]] (!%p241_p2) }
   0xc   : > { %v288_v0 = vld [vmem:[%s858_s2] sm:$0xf]  ;;  %vm306_vm0 = vcmask 1043456   ;;  %v346_v1 = vld [vmem:[%s860_s4 + $0x18] sm:$0xff]  ;;  %s866_s0 = smov (!%p273_p3, %s659_s0), 7  ;;  %vm293_vm1 = vcmask 31744   ;;  %v469_v22 = vlaneseq  ;;  %v478_v24 = vstv %s676_s25 }
   0xd   : > { %663 = vmatpush.msk.msra.mxu0 %vm306_vm0, %v288_v0  ;;  %376 = vmatpush.msra.mxu1 %v346_v1  ;;  %s660_s13 = sshll.u32 %s866_s0, 3  ;;  %v345_v6 = vld [vmem:[%s860_s4 + $0x10] sm:$0xff]  ;;  %v344_v7 = vld [vmem:[%s860_s4 + $0x8] sm:$0xff]  ;;  %v343_v8 = vld [vmem:[%s860_s4] sm:$0xff]  ;;  %vm351_vm2 = vcmask 261120  }
   0xe   : > { %687 = vmatpush.msra.mxu3 %v346_v1  ;;  %s276_s16 = scalar_lea.vmem %s857_s1, %s660_s13  ;;  %v703_v9 = vld [vmem:[%s859_s3] ss:$0 sm:$0xff]  ;;  %v470_v23 = vshrl.u32 %v469_v22, 7  ;;  %v487_v27 = vstv %s476_s26  ;;  %v475_v28 = vand.u32 127, %v469_v22  ;;  %v547_v33 = vld [vmem:[%s862_s6 + $0x18] sm:$0xff]  ;;  %v546_v36 = vld [vmem:[%s862_s6 + $0x10] sm:$0xff]  ;;  %s282_s21 = scalar_lea.vmem %s864_s8, %s660_s13 }
   0xf   : > { %v284_v2 = vld [vmem:[%s276_s16] sm:$0xff]  ;;  %v285_v3 = vld [vmem:[%s276_s16 + $0x8] sm:$0xff]  ;;  %v286_v4 = vld [vmem:[%s276_s16 + $0x10] sm:$0xff]  ;;  %377 = vmatpush.msra.mxu1 %v345_v6  ;;  %691 = vmatpush.msra.mxu2 %v547_v33 }
  0x10   : > { %664 = vmatmul.msk.f32.vlgmr.msra.gmra.mxu0 %vm293_vm1, %v284_v2  ;;  %v287_v5 = vld [vmem:[%s276_s16 + $0x18] sm:$0xff]  ;;  %688 = vmatpush.msra.mxu3 %v345_v6  ;;  %v479_v25 = vadd.s32 %v478_v24, %v470_v23  ;;  %v471_v30 = vadd.s32 8, %v470_v23  ;;  %v472_v37 = vadd.s32 16, %v470_v23  ;;  %v545_v38 = vld [vmem:[%s862_s6 + $0x8] sm:$0xff]  ;;  %v832_v41 = vld [vmem:[%s861_s5] ss:$0 sm:$0xff] }
  0x11   : > { %378 = vmatpush.msra.mxu1 %v344_v7  ;;  %692 = vmatpush.msra.mxu2 %v546_v36  ;;  %v544_v42 = vld [vmem:[%s862_s6] sm:$0xff]  ;;  %v473_v49 = vadd.s32 24, %v470_v23 }
  0x12   : > { %689 = vmatpush.msra.mxu3 %v344_v7  ;;  %v483_v26 = vmul.u32 32, %v479_v25  ;;  %v480_v32 = vadd.s32 %v478_v24, %v471_v30  ;;  %v481_v43 = vadd.s32 %v478_v24, %v472_v37 }
  0x13   : > { %379 = vmatpush.msra.mxu1 %v343_v8  ;;  %693 = vmatpush.msra.mxu2 %v545_v38  ;;  %v482_v54 = vadd.s32 %v478_v24, %v473_v49 }
  0x14   : > { %690 = vmatpush.msra.mxu3 %v343_v8  ;;  %v488_v29 = vadd.s32 %v487_v27, %v483_v26  ;;  %v484_v35 = vmul.u32 32, %v480_v32  ;;  %v485_v48 = vmul.u32 32, %v481_v43 }
  0x15   : > { %576 = vmatpush.msrb.mxu1 %v547_v33  ;;  %694 = vmatpush.msra.mxu2 %v544_v42  ;;  %v486_v58 = vmul.u32 32, %v482_v54 }
  0x16   : > { %v492_v31 = vadd.s32 %v488_v29, %v475_v28  ;;  %v489_v40 = vadd.s32 %v487_v27, %v484_v35  ;;  %v490_v53 = vadd.s32 %v487_v27, %v485_v48 }
  0x17   : > { %577 = vmatpush.msrb.mxu1 %v546_v36  ;;  %v491_v1 = vadd.s32 %v487_v27, %v486_v58 }
  0x18   : > { %665 = vmatmul.msk.f32.gmra.mxu0 %vm293_vm1, %v285_v3  ;;  %v496_v34 = vshrl.u32 %v492_v31, 16  ;;  %v493_v46 = vadd.s32 %v489_v40, %v475_v28  ;;  %v494_v57 = vadd.s32 %v490_v53, %v475_v28 }
  0x19   : > { %578 = vmatpush.msrb.mxu1 %v545_v38  ;;  %v495_v7 = vadd.s32 %v491_v1, %v475_v28 }
  0x1a   : > { %v500_v39 = vxor.u32 %v496_v34, %v492_v31  ;;  %v497_v52 = vshrl.u32 %v493_v46, 16  ;;  %v498_v0 = vshrl.u32 %v494_v57, 16 }
  0x1b   : > { %579 = vmatpush.msrb.mxu1 %v544_v42 }
  0x1c   : > { %v504_v45 = vmul.u32 2146121005, %v500_v39  ;;  %v501_v56 = vxor.u32 %v497_v52, %v493_v46  ;;  %v502_v6 = vxor.u32 %v498_v0, %v494_v57 }
  0x1e   : > { %v508_v51 = vshrl.u32 %v504_v45, 15  ;;  %v505_v62 = vmul.u32 2146121005, %v501_v56 }
  0x20   : > { %666 = vmatmul.msk.f32.gmra.mxu0 %vm293_vm1, %v286_v4  ;;  %v512_v55 = vxor.u32 %v508_v51, %v504_v45  ;;  %v509_v4 = vshrl.u32 %v505_v62, 15 }
  0x22   : > { %v516_v61 = vmul.u32 2221713035, %v512_v55 }
  0x24   : > { %v520_v3 = vshrl.u32 %v516_v61, 16 }
  0x28   : > { %667 = vmatmul.msk.f32.gmra.mxu0 %vm293_vm1, %v287_v5 }
  0x8d   : > { %v327_v10 = vpop.f32.mrf.mxu0 }
  0x8e   : > { %v328_v11 = vadd.f32 %v703_v9, %v327_v10  ;;  %v513_v10 = vxor.u32 %v509_v4, %v505_v62 }
  0x90   : > { %v339_v12 = vmax.f32 %v328_v11, 0.0 }
  0x92   : > { %668 = vmatmul.msk.f32.vlgmr.msra.gmra.mxu1 %vm351_vm2, %v339_v12 }
  0x95   : > { %v330_v13 = vpop.f32.mrf.mxu0 }
  0x96   : > { %v331_v14 = vadd.f32 %v703_v9, %v330_v13  ;;  %v506_v13 = vmul.u32 2146121005, %v502_v6 }
  0x98   : > { %v340_v15 = vmax.f32 %v331_v14, 0.0  ;;  %v499_v14 = vshrl.u32 %v495_v7, 16  ;;  %v510_v25 = vshrl.u32 %v506_v13, 15 }
  0x9a   : > { %669 = vmatmul.msk.f32.vlgmr.msra.gmra.mxu3 %vm351_vm2, %v340_v15  ;;  %v503_v26 = vxor.u32 %v499_v14, %v495_v7  ;;  %v514_v33 = vxor.u32 %v510_v25, %v506_v13 }
  0x9c   : > { %v507_v34 = vmul.u32 2146121005, %v503_v26  ;;  %v518_v43 = vmul.u32 2221713035, %v514_v33 }
  0x9d   : > { %v333_v16 = vpop.f32.mrf.mxu0 }
  0x9e   : > { %v334_v17 = vadd.f32 %v703_v9, %v333_v16  ;;  %v522_v49 = vshrl.u32 %v518_v43, 16 }
  0xa0   : > { %v341_v18 = vmax.f32 %v334_v17, 0.0  ;;  %v526_v57 = vxor.u32 %v522_v49, %v518_v43 }
  0xa2   : > { %670 = vmatmul.msk.f32.gmra.mxu3 %vm351_vm2, %v341_v18  ;;  %v679_v1 = vxor.u32 2147483648, %v526_v57 }
  0xa4   : > { %vm536_vm0 = vcmp.ge.s32.totalorder %v679_v1, 3865470566 }
  0xa5   : > { %v336_v19 = vpop.f32.mrf.mxu0 }
  0xa6   : > { %v337_v20 = vadd.f32 %v703_v9, %v336_v19  ;;  %v524_v9 = vxor.u32 %v520_v3, %v516_v61  ;;  %v517_v19 = vmul.u32 2221713035, %v513_v10 }
  0xa8   : > { %v342_v21 = vmax.f32 %v337_v20, 0.0  ;;  %v677_v18 = vxor.u32 2147483648, %v524_v9  ;;  %v521_v30 = vshrl.u32 %v517_v19, 16 }
  0xaa   : > { %671 = vmatmul.msk.f32.gmra.mxu3 %vm351_vm2, %v342_v21  ;;  %vm530_vm6 = vcmp.ge.s32.totalorder %v677_v18, 3865470566  ;;  %v525_v39 = vxor.u32 %v521_v30, %v517_v19 }
 0x10f   : > { %v381_v44 = vpop.f32.mrf.mxu1 }
 0x110   : > { %v382_v47 = vadd.f32 %v832_v41, %v381_v44  ;;  %v511_v44 = vshrl.u32 %v507_v34, 15 }
 0x112   : > { %v672_v50 = vmul.f32 -1.442695, %v382_v47  ;;  %v678_v47 = vxor.u32 2147483648, %v525_v39 }
 0x114   : > { %706 = vpow2.f32 %v672_v50  ;;  %v515_v50 = vxor.u32 %v511_v44, %v507_v34  ;;  %vm533_vm10 = vcmp.ge.s32.totalorder %v678_v47, 3865470566 }
 0x116   : > { %v519_v58 = vmul.u32 2221713035, %v515_v50 }
 0x11a   : > { %v707_v59 = vpop.eup %706 }
 0x11b   : > { %v405_v60 = vadd.f32 1.0, %v707_v59 }
 0x11d   : > { %708 = vrcp.f32 %v405_v60  ;;  %v384_v63 = vpop.f32.mrf.mxu3  ;;  %v420_v17 = vand.u32 2147483648, %v405_v60  ;;  %v418_v23 = vand.u32 2147483647, %v405_v60  ;;  %vm414_vm4 = vweird.f32 %v405_v60 }
 0x11e   : > { %v385_v2 = vadd.f32 %v832_v41, %v384_v63 }
 0x11f   : > { %v421_v28 = vor.u32 1.1754944e-38, %v420_v17  ;;  %vm419_vm7 = vcmp.eq.f32.partialorder %v418_v23, 8.507059e+37  ;;  %v705_v23 = vld [vmem:[%s863_s7] ss:$0 sm:$0xff] }
 0x120   : > { %v673_v5 = vmul.f32 -1.442695, %v385_v2  ;;  %v523_v2 = vshrl.u32 %v519_v58, 16 }
 0x122   : > { %710 = vpow2.f32 %v673_v5 }
 0x123   : > { %v709_v8 = vpop.eup %708 }
 0x124   : > { %v410_v11 = vmul.f32 %v709_v8, %v405_v60  ;;  %vm415_vm3 = vweird.f32 %v709_v8 }
 0x125   : > { %v387_v12 = vpop.f32.mrf.mxu3  ;;  %vm416_vm5 = vmor %vm414_vm4, %vm415_vm3 }
 0x126   : > { %v388_v15 = vadd.f32 %v832_v41, %v387_v12  ;;  %v411_v16 = vsub.f32 1.0, %v410_v11 }
 0x128   : > { %v711_v20 = vpop.eup %710  ;;  %v674_v21 = vmul.f32 -1.442695, %v388_v15  ;;  %v412_v22 = vmul.f32 %v709_v8, %v411_v16 }
 0x129   : > { %v406_v24 = vadd.f32 1.0, %v711_v20 }
 0x12a   : > { %712 = vpow2.f32 %v674_v21  ;;  %v413_v27 = vadd.f32 %v709_v8, %v412_v22 }
 0x12b   : > { %714 = vrcp.f32 %v406_v24  ;;  %v435_v48 = vand.u32 2147483648, %v406_v24  ;;  %vm429_vm9 = vweird.f32 %v406_v24 }
 0x12c   : > { %v417_v29 = vsel %vm416_vm5, %v709_v8, %v413_v27  ;;  %v527_v8 = vxor.u32 %v523_v2, %v519_v58 }
 0x12d   : > { %v390_v31 = vpop.f32.mrf.mxu3  ;;  %v422_v32 = vsel %vm419_vm7, %v421_v28, %v417_v29  ;;  %v436_v56 = vor.u32 1.1754944e-38, %v435_v48 }
 0x12e   : > { %v391_v35 = vadd.f32 %v832_v41, %v390_v31  ;;  %v540_v36 = vsel %vm530_vm6, %v422_v32, 0.0  ;;  %v433_v41 = vand.u32 2147483647, %v406_v24  ;;  %v680_v15 = vxor.u32 2147483648, %v527_v8 }
 0x12f   : > { %681 = vmatmul.msk.f32.vlgmr.msrb.gmra.mxu1 %vm351_vm2, %v540_v36 }
 0x130   : > { %v713_v37 = vpop.eup %712  ;;  %v675_v38 = vmul.f32 -1.442695, %v391_v35  ;;  %vm434_vm12 = vcmp.eq.f32.partialorder %v433_v41, 8.507059e+37  ;;  %vm539_vm6 = vcmp.ge.s32.totalorder %v680_v15, 3865470566 }
 0x131   : > { %v715_v40 = vpop.eup %714  ;;  %v407_v42 = vadd.f32 1.0, %v713_v37 }
 0x132   : > { %716 = vpow2.f32 %v675_v38  ;;  %v425_v45 = vmul.f32 %v715_v40, %v406_v24  ;;  %vm430_vm8 = vweird.f32 %v715_v40 }
 0x133   : > { %718 = vrcp.f32 %v407_v42  ;;  %vm431_vm11 = vmor %vm429_vm9, %vm430_vm8  ;;  %v450_v0 = vand.u32 2147483648, %v407_v42  ;;  %v448_v4 = vand.u32 2147483647, %v407_v42  ;;  %vm444_vm14 = vweird.f32 %v407_v42 }
 0x134   : > { %v426_v46 = vsub.f32 1.0, %v425_v45  ;;  %vm593_vm8 = vcmask 15360  }
 0x135   : > { %v451_v7 = vor.u32 1.1754944e-38, %v450_v0  ;;  %vm449_vm1 = vcmp.eq.f32.partialorder %v448_v4, 8.507059e+37 }
 0x136   : > { %v427_v51 = vmul.f32 %v715_v40, %v426_v46 }
 0x138   : > { %v717_v52 = vpop.eup %716  ;;  %v428_v53 = vadd.f32 %v715_v40, %v427_v51 }
 0x139   : > { %v719_v54 = vpop.eup %718  ;;  %v408_v55 = vadd.f32 1.0, %v717_v52 }
 0x13a   : > { %v432_v59 = vsel %vm431_vm11, %v715_v40, %v428_v53  ;;  %v440_v60 = vmul.f32 %v719_v54, %v407_v42  ;;  %vm445_vm13 = vweird.f32 %v719_v54 }
 0x13b   : > { %720 = vrcp.f32 %v408_v55  ;;  %v437_v61 = vsel %vm434_vm12, %v436_v56, %v432_v59  ;;  %vm446_vm15 = vmor %vm444_vm14, %vm445_vm13  ;;  %v465_v14 = vand.u32 2147483648, %v408_v55  ;;  %v463_v17 = vand.u32 2147483647, %v408_v55 }
 0x13c   : > { %v541_v62 = vsel %vm533_vm10, %v437_v61, 0.0  ;;  %v441_v63 = vsub.f32 1.0, %v440_v60  ;;  %vm459_vm4 = vweird.f32 %v408_v55 }
 0x13d   : > { %682 = vmatmul.msk.f32.vlgmr.msra.gmra.mxu2 %vm351_vm2, %v541_v62  ;;  %v466_v19 = vor.u32 1.1754944e-38, %v465_v14  ;;  %vm464_vm7 = vcmp.eq.f32.partialorder %v463_v17, 8.507059e+37 }
 0x13e   : > { %v442_v3 = vmul.f32 %v719_v54, %v441_v63 }
 0x140   : > { %v443_v5 = vadd.f32 %v719_v54, %v442_v3 }
 0x141   : > { %v721_v6 = vpop.eup %720 }
 0x142   : > { %v447_v9 = vsel %vm446_vm15, %v719_v54, %v443_v5  ;;  %v455_v10 = vmul.f32 %v721_v6, %v408_v55  ;;  %vm460_vm3 = vweird.f32 %v721_v6 }
 0x143   : > { %v452_v11 = vsel %vm449_vm1, %v451_v7, %v447_v9  ;;  %vm461_vm5 = vmor %vm459_vm4, %vm460_vm3 }
 0x144   : > { %v542_v12 = vsel %vm536_vm0, %v452_v11, 0.0  ;;  %v456_v13 = vsub.f32 1.0, %v455_v10 }
 0x145   : > { %683 = vmatmul.msk.f32.gmra.mxu2 %vm351_vm2, %v542_v12 }
 0x146   : > { %v457_v16 = vmul.f32 %v721_v6, %v456_v13 }
 0x148   : > { %v458_v18 = vadd.f32 %v721_v6, %v457_v16 }
 0x14a   : > { %v462_v20 = vsel %vm461_vm5, %v721_v6, %v458_v18 }
 0x14b   : > { %v467_v21 = vsel %vm464_vm7, %v466_v19, %v462_v20 }
 0x14c   : > { %v543_v22 = vsel %vm539_vm6, %v467_v21, 0.0 }
 0x14d   : > { %684 = vmatmul.msk.f32.gmra.mxu2 %vm351_vm2, %v543_v22 }
 0x1ac   : > { %v581_v24 = vpop.f32.mrf.mxu1 }
 0x1ad   : > { %v582_v25 = vadd.f32 %v705_v23, %v581_v24 }
 0x1af   : > { %594 = vst.msk [vmem:[%s282_s21] sm:$0xff] %vm593_vm8, %v582_v25 }
 0x1c0   : > { %v584_v26 = vpop.f32.mrf.mxu2 }
 0x1c1   : > { %v585_v27 = vadd.f32 %v705_v23, %v584_v26 }
 0x1c3   : > { %595 = vst.msk [vmem:[%s282_s21 + $0x8] sm:$0xff] %vm593_vm8, %v585_v27 }
 0x1c8   : > { %v587_v28 = vpop.f32.mrf.mxu2 }
 0x1c9   : > { %v588_v29 = vadd.f32 %v705_v23, %v587_v28 }
 0x1cb   : > { %596 = vst.msk [vmem:[%s282_s21 + $0x10] sm:$0xff] %vm593_vm8, %v588_v29 }
 0x1d0   : > { %v590_v30 = vpop.f32.mrf.mxu2 }
 0x1d1   : > { %v591_v31 = vadd.f32 %v705_v23, %v590_v30 }
 0x1d3   : > { %597 = vst.msk [vmem:[%s282_s21 + $0x18] sm:$0xff] %vm593_vm8, %v591_v31 }
 0x1d4 PF: > { %s19_s29 = sadd.s32 1, %s728_s29  }
 0x1d5   : > { %p16_p4 = scmp.ge.s32.totalorder %s19_s29, 4  }
 0x1d7   :  { %18 = sbr.rel (!%p16_p4) target bundleno = 2 (0x2), region = 78 }

</bundles_post_ra>
